<compile_context>
chip_gen: v5e
topology: v5e:2x2
jax: 0.10.0
libtpu: 0.0.40
codegen_flags: <defaults>
</compile_context>

<pallas_src>
import jax
import jax.numpy as jnp
from jax.experimental import pallas as pl
from jax.experimental.pallas import tpu as pltpu

IN_FEATURES = 32 * 32 * 3   # 3072
OUT_FEATURES = 100
N_PAD = 128                 # lane-dense padded output width
MAX_TILE_M = 256            # batch tile: fits comfortably in VMEM on v5e/v6e/v7x


def _round_up(x, m):
    return ((x + m - 1) // m) * m


def _logreg_kernel(x_ref, w_ref, b_ref, o_ref):
    # (TILE_M, K) bf16 @ (K, 128) bf16 -> f32 on the MXU; bias add in f32.
    acc = jnp.dot(x_ref[...], w_ref[...], preferred_element_type=jnp.float32)
    o_ref[...] = (acc + b_ref[...]).astype(o_ref.dtype)


def prepare_params(weight, bias, param_dtype=jnp.bfloat16):
    """One-time parameter prep (hoisted out of the per-call hot path).

    weight: (100, 3072) torch layout -> transposed, cast, zero-padded (3072, 128)
    bias:   (100,)                   -> (1, 128) f32, padded lanes are zero
    """
    w_t = jnp.transpose(weight).astype(param_dtype)              # (3072, 100)
    w_pad = jnp.pad(w_t, ((0, 0), (0, N_PAD - OUT_FEATURES)))    # (3072, 128)
    b_pad = jnp.pad(bias.astype(jnp.float32),
                    (0, N_PAD - OUT_FEATURES)).reshape(1, N_PAD)  # (1, 128)
    return w_pad, b_pad


def logistic_regression_forward(x_nchw, w_pad, b_pad):
    """x_nchw: (B, 3, 32, 32); w_pad: (3072, 128) bf16; b_pad: (1, 128) f32.
    Returns (B, 100) f32."""
    B = x_nchw.shape[0]
    compute_dtype = w_pad.dtype

    # Flatten NCHW -> (B, 3072) in C-major order (matches torch .view).
    x2d = x_nchw.reshape(B, -1).astype(compute_dtype)

    # Pad the batch to a full sublane/tile multiple so every load/store is
    # full-width, then tile the padded batch over the grid.
    tile_m = min(MAX_TILE_M, _round_up(B, 8))
    b_rows = _round_up(B, tile_m)
    if b_rows != B:
        x2d = jnp.pad(x2d, ((0, b_rows - B), (0, 0)))
    grid_m = b_rows // tile_m

    cost = pl.CostEstimate(
        flops=2 * b_rows * IN_FEATURES * N_PAD,
        transcendentals=0,
        bytes_accessed=(x2d.size * x2d.dtype.itemsize
                        + w_pad.size * w_pad.dtype.itemsize
                        + b_pad.size * b_pad.dtype.itemsize
                        + b_rows * N_PAD * 4),
    )

    out_pad = pl.pallas_call(
        _logreg_kernel,
        out_shape=jax.ShapeDtypeStruct((b_rows, N_PAD), jnp.float32),
        grid_spec=pltpu.PrefetchScalarGridSpec(
            num_scalar_prefetch=0,
            grid=(grid_m,),
            in_specs=[
                # x: tiled over the batch -> double-buffered by the pipeline.
                pl.BlockSpec((tile_m, IN_FEATURES), lambda i: (i, 0)),
                # weight / bias: same block every step -> resident in VMEM.
                pl.BlockSpec((IN_FEATURES, N_PAD), lambda i: (0, 0)),
                pl.BlockSpec((1, N_PAD), lambda i: (0, 0)),
            ],
            out_specs=pl.BlockSpec((tile_m, N_PAD), lambda i: (i, 0)),
        ),
        compiler_params=pltpu.CompilerParams(
            dimension_semantics=("parallel",),
        ),
        cost_estimate=cost,
    )(x2d, w_pad, b_pad)

    # Drop batch padding and the zero-padded output lanes.
    return out_pad[:B, :OUT_FEATURES]


if __name__ == "__main__":
    key = jax.random.PRNGKey(0)
    kx, kw, kb = jax.random.split(key, 3)

    # CIFAR-like images (B, 3, 32, 32), small deterministic example.
    B = 2
    x = jax.random.normal(kx, (B, 3, 32, 32), dtype=jnp.float32)

    # Deterministic parameter init (same shapes as nn.Linear(3072, 100)).
    bound = 1.0 / (IN_FEATURES ** 0.5)
    weight = jax.random.uniform(
        kw, (OUT_FEATURES, IN_FEATURES), minval=-bound, maxval=bound,
        dtype=jnp.float32)
    bias = jax.random.uniform(
        kb, (OUT_FEATURES,), minval=-bound, maxval=bound, dtype=jnp.float32)

    # One-time parameter prep (hoisted out of the forward hot path).
    w_pad, b_pad = prepare_params(weight, bias)

    out = logistic_regression_forward(x, w_pad, b_pad)
    out = jax.block_until_ready(out)

    # Reference check against plain f32 JAX (tolerance loosened for the bf16
    # matmul inputs; accumulation is still f32).
    ref = x.reshape(B, -1) @ weight.T + bias
    assert out.shape == (B, OUT_FEATURES)
    assert jnp.allclose(out, ref, atol=2e-2, rtol=2e-2), (
        float(jnp.max(jnp.abs(out - ref))))

    print("KERNEL_OK")
</pallas_src>

<mosaic_0001>
module attributes {stable_mosaic.version = 11 : i64} {
  func.func @_logreg_kernel(%arg0: i32, %arg1: memref<8x3072xbf16, #tpu.memory_space<vmem>>, %arg2: memref<3072x128xbf16, #tpu.memory_space<vmem>>, %arg3: memref<1x128xf32, #tpu.memory_space<vmem>>, %arg4: memref<8x128xf32, #tpu.memory_space<vmem>>) attributes {dimension_semantics = [#tpu.dimension_semantics<parallel>], iteration_bounds = array<i64: 1>, scalar_prefetch = 0 : i64, scratch_operands = 0 : i64, tpu.core_type = #tpu.core_type<tc>, window_params = [{transform_indices = @transform_0, window_bounds = array<i64: 8, 3072>}, {pipeline_mode = #tpu.pipeline_mode<synchronous>, transform_indices = @transform_1, window_bounds = array<i64: 3072, 128>}, {pipeline_mode = #tpu.pipeline_mode<synchronous>, transform_indices = @transform_2, window_bounds = array<i64: 1, 128>}, {transform_indices = @transform_3, window_bounds = array<i64: 8, 128>}]} {
    %c0 = arith.constant 0 : index
    %c0_0 = arith.constant 0 : index
    %0 = vector.load %arg1[%c0, %c0_0] : memref<8x3072xbf16, #tpu.memory_space<vmem>>, vector<8x3072xbf16>
    %c0_1 = arith.constant 0 : index
    %c0_2 = arith.constant 0 : index
    %1 = vector.load %arg2[%c0_1, %c0_2] : memref<3072x128xbf16, #tpu.memory_space<vmem>>, vector<3072x128xbf16>
    %cst = arith.constant dense<0.000000e+00> : vector<8x128xf32>
    %2 = tpu.matmul %0, %1, %cst {dimension_numbers = #tpu.dot_dimension_numbers<[1], [0], [0], [1], [0, 0, 1, 1], [], []>} : vector<8x3072xbf16>, vector<3072x128xbf16>, vector<8x128xf32> -> vector<8x128xf32>
    %c0_3 = arith.constant 0 : index
    %c0_4 = arith.constant 0 : index
    %3 = vector.load %arg3[%c0_3, %c0_4] : memref<1x128xf32, #tpu.memory_space<vmem>>, vector<1x128xf32>
    %4 = vector.broadcast %3 : vector<1x128xf32> to vector<8x128xf32>
    %5 = arith.addf %2, %4 : vector<8x128xf32>
    %c0_5 = arith.constant 0 : index
    %c0_6 = arith.constant 0 : index
    %6 = vector.load %arg4[%c0_5, %c0_6] : memref<8x128xf32, #tpu.memory_space<vmem>>, vector<8x128xf32>
    tpu.vector_store %arg4[%c0_5, %c0_6], %5 {strides = array<i32>} : memref<8x128xf32, #tpu.memory_space<vmem>>, vector<8x128xf32>,
    return
  }
  func.func @transform_0(%arg0: i32) -> (i32, i32) {
    %c0_i32 = arith.constant 0 : i32
    %c0_i32_0 = arith.constant 0 : i32
    return %arg0, %c0_i32 : i32, i32
  }
  func.func @transform_1(%arg0: i32) -> (i32, i32) {
    %c0_i32 = arith.constant 0 : i32
    %c0_i32_0 = arith.constant 0 : i32
    %c0_i32_1 = arith.constant 0 : i32
    return %c0_i32, %c0_i32_0 : i32, i32
  }
  func.func @transform_2(%arg0: i32) -> (i32, i32) {
    %c0_i32 = arith.constant 0 : i32
    %c0_i32_0 = arith.constant 0 : i32
    %c0_i32_1 = arith.constant 0 : i32
    return %c0_i32, %c0_i32_0 : i32, i32
  }
  func.func @transform_3(%arg0: i32) -> (i32, i32) {
    %c0_i32 = arith.constant 0 : i32
    %c0_i32_0 = arith.constant 0 : i32
    return %arg0, %c0_i32 : i32, i32
  }
}

</mosaic_0001>

<bundles_post_ra>
// kernel: tpu_custom_call.1
= control target key start
LH: loop header
LB: loop body
LE: loop exit
PB: predicated region body
PF: predicated region fallthrough
CT: control target
= control target key end

     0   :  { %8 = vsyncpa [#allocation3], 0  ;;  %s3093_s0 = inlined_call_operand.hbm [shape: bf16[8,3072], index: 0, kind: input, shape index: {}]   ;;  %s3094_s1 = inlined_call_operand.hbm [shape: bf16[3072,128], index: 1, kind: input, shape index: {}]   ;;  %s3095_s2 = inlined_call_operand.vmem [shape: f32[1,128], index: 2, kind: input, shape index: {}]   ;;  %s3096_s3 = inlined_call_operand.hbm [shape: f32[8,128], index: 3, kind: output, shape index: {}]  }
   0x1   :  { %9 = vsyncpa [#allocation6], 0 }
   0x2   :  { %10 = vsyncpa [#allocation4], 0  ;;  %s16_s14 = sshll.u32 %s3093_s0, 4  ;;  %s3056_s15 = smov [#allocation2]   ;;  %s17_s14 = int_to_ptr.hbm [resolvable:$true] %s16_s14 }
   0x3   :  { %s18_s16 = sshll.u32 %s3056_s15, 4  ;;  %s26_s19 = sshll.u32 %s3094_s1, 4  ;;  %s19_s16 = int_to_ptr.vmem [resolvable:$true] %s18_s16  ;;  %s27_s19 = int_to_ptr.hbm [resolvable:$true] %s26_s19 }
   0x4   :  { %21 = dma.hbm_to_vmem [thread:$0]  %s17_s14, 1536, %s19_s16, [#allocation3]  }
   0x5   :  { %s3057_s20 = smov [#allocation5]   ;;  %s3058_s22 = smov 64  }
   0x6   :  { %s28_s21 = sshll.u32 %s3057_s20, 4  ;;  %s3059_s23 = smov 4   ;;  %s29_s21 = int_to_ptr.vmem [resolvable:$true] %s28_s21 }
   0x7   :  { %34 = dma.hbm_to_vmem [thread:$0]  %s27_s19, 24576, %s29_s21, [#allocation6], %s3058_s22, %s3058_s22, %s3059_s23  }
   0x8   :  { %3050 = dma.done.wait [#allocation3], 1536  }
   0x9   :  { %3051 = vsyncadd [#allocation3], 4294965760 }
   0xa   :  { %3052 = dma.done.wait [#allocation6], 24576  }
   0xb   :  { %3053 = vsyncadd [#allocation6], 4294942720  ;;  %v2787_v0 = vld [vmem:[#allocation5 + $0x38] sm:$0xff]  ;;  %v2786_v4 = vld [vmem:[#allocation5 + $0x30] sm:$0xff]  ;;  %s2001_s27 = sshll.u32 %s3096_s3, 4  ;;  %s2002_s27 = int_to_ptr.hbm [resolvable:$true] %s2001_s27 }
   0xc   :  { %v2795_v1 = vld [vmem:[#allocation5 + $0x78] sm:$0xff]  ;;  %1681 = vmatpush.bf16.msra.mxu0 %v2787_v0  ;;  %v2794_v5 = vld [vmem:[#allocation5 + $0x70] sm:$0xff]  ;;  %v2785_v8 = vld [vmem:[#allocation5 + $0x28] sm:$0xff] }
   0xd   :  { %v2803_v2 = vld [vmem:[#allocation5 + $0xb8] sm:$0xff]  ;;  %1694 = vmatpush.bf16.msra.mxu1 %v2795_v1  ;;  %v2802_v6 = vld [vmem:[#allocation5 + $0xb0] sm:$0xff]  ;;  %v2793_v9 = vld [vmem:[#allocation5 + $0x68] sm:$0xff] }
   0xe   :  { %v2811_v3 = vld [vmem:[#allocation5 + $0xf8] sm:$0xff]  ;;  %1707 = vmatpush.bf16.msra.mxu2 %v2803_v2  ;;  %v2810_v7 = vld [vmem:[#allocation5 + $0xf0] sm:$0xff]  ;;  %v2801_v10 = vld [vmem:[#allocation5 + $0xa8] sm:$0xff] }
   0xf   :  { %1720 = vmatpush.bf16.msra.mxu3 %v2811_v3  ;;  %v2809_v11 = vld [vmem:[#allocation5 + $0xe8] sm:$0xff]  ;;  %v2784_v12 = vld [vmem:[#allocation5 + $0x20] sm:$0xff]  ;;  %v2783_v16 = vld [vmem:[#allocation5 + $0x18] sm:$0xff] }
  0x10   :  { %1682 = vmatpush.bf16.msra.mxu0 %v2786_v4  ;;  %v2792_v13 = vld [vmem:[#allocation5 + $0x60] sm:$0xff]  ;;  %v2791_v17 = vld [vmem:[#allocation5 + $0x58] sm:$0xff]  ;;  %v2782_v20 = vld [vmem:[#allocation5 + $0x10] sm:$0xff] }
  0x11   :  { %1695 = vmatpush.bf16.msra.mxu1 %v2794_v5  ;;  %v2800_v14 = vld [vmem:[#allocation5 + $0xa0] sm:$0xff]  ;;  %v2799_v18 = vld [vmem:[#allocation5 + $0x98] sm:$0xff]  ;;  %v2790_v21 = vld [vmem:[#allocation5 + $0x50] sm:$0xff] }
  0x12   :  { %1708 = vmatpush.bf16.msra.mxu2 %v2802_v6  ;;  %v2808_v15 = vld [vmem:[#allocation5 + $0xe0] sm:$0xff]  ;;  %v2807_v19 = vld [vmem:[#allocation5 + $0xd8] sm:$0xff]  ;;  %v2798_v22 = vld [vmem:[#allocation5 + $0x90] sm:$0xff] }
  0x13   :  { %1721 = vmatpush.bf16.msra.mxu3 %v2810_v7  ;;  %v2806_v23 = vld [vmem:[#allocation5 + $0xd0] sm:$0xff]  ;;  %v2781_v24 = vld [vmem:[#allocation5 + $0x8] sm:$0xff]  ;;  %v45_v29 = vld [vmem:[#allocation2] sm:$0xff] }
  0x14   :  { %1683 = vmatpush.bf16.msra.mxu0 %v2785_v8  ;;  %v2789_v25 = vld [vmem:[#allocation5 + $0x48] sm:$0xff]  ;;  %v2780_v30 = vld [vmem:[#allocation5] sm:$0xff]  ;;  %v457_v33 = vunpack.c.l.b16 %v45_v29  ;;  %v458_v37 = vunpack.c.h.b16 %v45_v29  ;;  %v2819_v38 = vld [vmem:[#allocation5 + $0x138] sm:$0xff] }
  0x15   :  { %1696 = vmatpush.bf16.msra.mxu1 %v2793_v9  ;;  %v2797_v26 = vld [vmem:[#allocation5 + $0x88] sm:$0xff]  ;;  %v2788_v31 = vld [vmem:[#allocation5 + $0x40] sm:$0xff]  ;;  %v2827_v39 = vld [vmem:[#allocation5 + $0x178] sm:$0xff] }
  0x16   :  { %1709 = vmatpush.bf16.msra.mxu2 %v2801_v10  ;;  %v2805_v27 = vld [vmem:[#allocation5 + $0xc8] sm:$0xff]  ;;  %v2796_v34 = vld [vmem:[#allocation5 + $0x80] sm:$0xff]  ;;  %v2835_v40 = vld [vmem:[#allocation5 + $0x1b8] sm:$0xff]  ;;  %v481_v43 = vpack.c.b16 %v457_v33, %v457_v33  ;;  %v482_v45 = vpack.c.b16 %v458_v37, %v458_v37 }
  0x17   :  { %1722 = vmatpush.bf16.msra.mxu3 %v2809_v11  ;;  %v46_v28 = vld [vmem:[#allocation2 + $0x8] sm:$0xff]  ;;  %v2804_v35 = vld [vmem:[#allocation5 + $0xc0] sm:$0xff]  ;;  %v2843_v41 = vld [vmem:[#allocation5 + $0x1f8] sm:$0xff] }
  0x18   :  { %1684 = vmatpush.bf16.msra.mxu0 %v2784_v12  ;;  %v459_v32 = vunpack.c.l.b16 %v46_v28  ;;  %v460_v36 = vunpack.c.h.b16 %v46_v28  ;;  %v2818_v46 = vld [vmem:[#allocation5 + $0x130] sm:$0xff]  ;;  %v2817_v50 = vld [vmem:[#allocation5 + $0x128] sm:$0xff]  ;;  %v2816_v54 = vld [vmem:[#allocation5 + $0x120] sm:$0xff] }
  0x19   :  { %1697 = vmatpush.bf16.msra.mxu1 %v2792_v13  ;;  %v2826_v47 = vld [vmem:[#allocation5 + $0x170] sm:$0xff]  ;;  %v2825_v51 = vld [vmem:[#allocation5 + $0x168] sm:$0xff]  ;;  %v2824_v55 = vld [vmem:[#allocation5 + $0x160] sm:$0xff] }
  0x1a   :  { %1710 = vmatpush.bf16.msra.mxu2 %v2800_v14  ;;  %v483_v42 = vpack.c.b16 %v459_v32, %v459_v32  ;;  %v484_v44 = vpack.c.b16 %v460_v36, %v460_v36  ;;  %v2834_v48 = vld [vmem:[#allocation5 + $0x1b0] sm:$0xff]  ;;  %v2833_v52 = vld [vmem:[#allocation5 + $0x1a8] sm:$0xff]  ;;  %v2832_v56 = vld [vmem:[#allocation5 + $0x1a0] sm:$0xff] }
  0x1b   :  { %1723 = vmatpush.bf16.msra.mxu3 %v2808_v15  ;;  %v2842_v49 = vld [vmem:[#allocation5 + $0x1f0] sm:$0xff]  ;;  %v2841_v53 = vld [vmem:[#allocation5 + $0x1e8] sm:$0xff]  ;;  %v2840_v57 = vld [vmem:[#allocation5 + $0x1e0] sm:$0xff] }
  0x1c   :  { %1685 = vmatpush.bf16.msra.mxu0 %v2783_v16  ;;  %v2815_v58 = vld [vmem:[#allocation5 + $0x118] sm:$0xff]  ;;  %v2814_v62 = vld [vmem:[#allocation5 + $0x110] sm:$0xff]  ;;  %v2813_v2 = vld [vmem:[#allocation5 + $0x108] sm:$0xff] }
  0x1d   :  { %1698 = vmatpush.bf16.msra.mxu1 %v2791_v17  ;;  %v2823_v59 = vld [vmem:[#allocation5 + $0x158] sm:$0xff]  ;;  %v2822_v63 = vld [vmem:[#allocation5 + $0x150] sm:$0xff]  ;;  %v2821_v3 = vld [vmem:[#allocation5 + $0x148] sm:$0xff] }
  0x1e   :  { %1711 = vmatpush.bf16.msra.mxu2 %v2799_v18  ;;  %v2831_v60 = vld [vmem:[#allocation5 + $0x198] sm:$0xff]  ;;  %v2830_v0 = vld [vmem:[#allocation5 + $0x190] sm:$0xff]  ;;  %v2829_v4 = vld [vmem:[#allocation5 + $0x188] sm:$0xff] }
  0x1f   :  { %1724 = vmatpush.bf16.msra.mxu3 %v2807_v19  ;;  %v2839_v61 = vld [vmem:[#allocation5 + $0x1d8] sm:$0xff]  ;;  %v2838_v1 = vld [vmem:[#allocation5 + $0x1d0] sm:$0xff]  ;;  %v2837_v5 = vld [vmem:[#allocation5 + $0x1c8] sm:$0xff] }
  0x20   :  { %1686 = vmatpush.bf16.msra.mxu0 %v2782_v20  ;;  %v48_v6 = vld [vmem:[#allocation2 + $0x18] sm:$0xff]  ;;  %v47_v7 = vld [vmem:[#allocation2 + $0x10] sm:$0xff]  ;;  %v2812_v8 = vld [vmem:[#allocation5 + $0x100] sm:$0xff] }
  0x21   :  { %1699 = vmatpush.bf16.msra.mxu1 %v2790_v21  ;;  %v2820_v9 = vld [vmem:[#allocation5 + $0x140] sm:$0xff]  ;;  %v463_v10 = vunpack.c.l.b16 %v48_v6  ;;  %v461_v11 = vunpack.c.l.b16 %v47_v7  ;;  %v464_v14 = vunpack.c.h.b16 %v48_v6  ;;  %v462_v15 = vunpack.c.h.b16 %v47_v7  ;;  %v2851_v16 = vld [vmem:[#allocation5 + $0x238] sm:$0xff]  ;;  %v2849_v28 = vld [vmem:[#allocation5 + $0x228] sm:$0xff] }
  0x22   :  { %1712 = vmatpush.bf16.msra.mxu2 %v2798_v22  ;;  %v2828_v12 = vld [vmem:[#allocation5 + $0x180] sm:$0xff]  ;;  %v2859_v17 = vld [vmem:[#allocation5 + $0x278] sm:$0xff]  ;;  %v2857_v29 = vld [vmem:[#allocation5 + $0x268] sm:$0xff] }
  0x23   :  { %1725 = vmatpush.bf16.msra.mxu3 %v2806_v23  ;;  %v2836_v13 = vld [vmem:[#allocation5 + $0x1c0] sm:$0xff]  ;;  %v2867_v18 = vld [vmem:[#allocation5 + $0x2b8] sm:$0xff]  ;;  %v487_v20 = vpack.c.b16 %v463_v10, %v463_v10  ;;  %v485_v21 = vpack.c.b16 %v461_v11, %v461_v11  ;;  %v488_v22 = vpack.c.b16 %v464_v14, %v464_v14  ;;  %v486_v23 = vpack.c.b16 %v462_v15, %v462_v15  ;;  %v2881_v6 = vld [vmem:[#allocation5 + $0x328] sm:$0xff] }
  0x24   :  { %1687 = vmatpush.bf16.msra.mxu0 %v2781_v24  ;;  %v2875_v19 = vld [vmem:[#allocation5 + $0x2f8] sm:$0xff]  ;;  %v2850_v24 = vld [vmem:[#allocation5 + $0x230] sm:$0xff]  ;;  %v2848_v32 = vld [vmem:[#allocation5 + $0x220] sm:$0xff] }
  0x25   :  { %1700 = vmatpush.bf16.msra.mxu1 %v2789_v25  ;;  %v2858_v25 = vld [vmem:[#allocation5 + $0x270] sm:$0xff]  ;;  %v2856_v33 = vld [vmem:[#allocation5 + $0x260] sm:$0xff]  ;;  %v2847_v36 = vld [vmem:[#allocation5 + $0x218] sm:$0xff] }
  0x26   :  { %1713 = vmatpush.bf16.msra.mxu2 %v2797_v26  ;;  %v2866_v26 = vld [vmem:[#allocation5 + $0x2b0] sm:$0xff]  ;;  %v2855_v37 = vld [vmem:[#allocation5 + $0x258] sm:$0xff]  ;;  %v2889_v7 = vld [vmem:[#allocation5 + $0x368] sm:$0xff] }
  0x27   :  { %1726 = vmatpush.bf16.msra.mxu3 %v2805_v27  ;;  %v2874_v27 = vld [vmem:[#allocation5 + $0x2f0] sm:$0xff]  ;;  %v2880_v10 = vld [vmem:[#allocation5 + $0x320] sm:$0xff]  ;;  %v2879_v14 = vld [vmem:[#allocation5 + $0x318] sm:$0xff] }
  0x28   :  { %1688 = vmatpush.bf16.msra.mxu0 %v2780_v30  ;;  %v2865_v30 = vld [vmem:[#allocation5 + $0x2a8] sm:$0xff]  ;;  %v2888_v11 = vld [vmem:[#allocation5 + $0x360] sm:$0xff]  ;;  %v2887_v15 = vld [vmem:[#allocation5 + $0x358] sm:$0xff] }
  0x29   :  { %1701 = vmatpush.bf16.msra.mxu1 %v2788_v31  ;;  %v2873_v31 = vld [vmem:[#allocation5 + $0x2e8] sm:$0xff] }
  0x2a   :  { %1714 = vmatpush.bf16.msra.mxu2 %v2796_v34  ;;  %v2864_v34 = vld [vmem:[#allocation5 + $0x2a0] sm:$0xff] }
  0x2b   :  { %1727 = vmatpush.bf16.msra.mxu3 %v2804_v35  ;;  %1689 = vmatmul.bf16.vlgmr.msra.gmra.mxu0 %v481_v43  ;;  %v2872_v35 = vld [vmem:[#allocation5 + $0x2e0] sm:$0xff]  ;;  %v2870_v43 = vld [vmem:[#allocation5 + $0x2d0] sm:$0xff] }
  0x2c   :  { %1733 = vmatpush.bf16.msrb.mxu0 %v2819_v38  ;;  %1702 = vmatmul.bf16.vlgmr.msra.gmra.mxu1 %v482_v45  ;;  %v2863_v38 = vld [vmem:[#allocation5 + $0x298] sm:$0xff]  ;;  %v2853_v45 = vld [vmem:[#allocation5 + $0x248] sm:$0xff] }
  0x2d   :  { %1746 = vmatpush.bf16.msrb.mxu1 %v2827_v39  ;;  %1715 = vmatmul.bf16.vlgmr.msra.gmra.mxu2 %v483_v42  ;;  %v2871_v39 = vld [vmem:[#allocation5 + $0x2d8] sm:$0xff]  ;;  %v2862_v42 = vld [vmem:[#allocation5 + $0x290] sm:$0xff] }
  0x2e   :  { %1759 = vmatpush.bf16.msrb.mxu2 %v2835_v40  ;;  %1728 = vmatmul.bf16.vlgmr.msra.gmra.mxu3 %v484_v44  ;;  %v2846_v40 = vld [vmem:[#allocation5 + $0x210] sm:$0xff]  ;;  %v2845_v44 = vld [vmem:[#allocation5 + $0x208] sm:$0xff] }
  0x2f   :  { %1772 = vmatpush.bf16.msrb.mxu3 %v2843_v41  ;;  %v2854_v41 = vld [vmem:[#allocation5 + $0x250] sm:$0xff] }
  0x30   :  { %1734 = vmatpush.bf16.msrb.mxu0 %v2818_v46  ;;  %v2861_v46 = vld [vmem:[#allocation5 + $0x288] sm:$0xff] }
  0x31   :  { %1747 = vmatpush.bf16.msrb.mxu1 %v2826_v47  ;;  %v2869_v47 = vld [vmem:[#allocation5 + $0x2c8] sm:$0xff] }
  0x32   :  { %1760 = vmatpush.bf16.msrb.mxu2 %v2834_v48  ;;  %v49_v48 = vld [vmem:[#allocation2 + $0x20] sm:$0xff] }
  0x33   :  { %1773 = vmatpush.bf16.msrb.mxu3 %v2842_v49  ;;  %v50_v49 = vld [vmem:[#allocation2 + $0x28] sm:$0xff] }
  0x34   :  { %1735 = vmatpush.bf16.msrb.mxu0 %v2817_v50  ;;  %v2844_v50 = vld [vmem:[#allocation5 + $0x200] sm:$0xff] }
  0x35   :  { %1748 = vmatpush.bf16.msrb.mxu1 %v2825_v51  ;;  %v2852_v51 = vld [vmem:[#allocation5 + $0x240] sm:$0xff] }
  0x36   :  { %1761 = vmatpush.bf16.msrb.mxu2 %v2833_v52  ;;  %v465_v52 = vunpack.c.l.b16 %v49_v48 }
  0x37   :  { %1774 = vmatpush.bf16.msrb.mxu3 %v2841_v53  ;;  %v467_v53 = vunpack.c.l.b16 %v50_v49 }
  0x38   :  { %1736 = vmatpush.bf16.msrb.mxu0 %v2816_v54  ;;  %v2860_v54 = vld [vmem:[#allocation5 + $0x280] sm:$0xff] }
  0x39   :  { %1749 = vmatpush.bf16.msrb.mxu1 %v2824_v55  ;;  %v2868_v55 = vld [vmem:[#allocation5 + $0x2c0] sm:$0xff] }
  0x3a   :  { %1762 = vmatpush.bf16.msrb.mxu2 %v2832_v56  ;;  %v466_v56 = vunpack.c.h.b16 %v49_v48  ;;  %v2913_v48 = vld [vmem:[#allocation5 + $0x428] sm:$0xff] }
  0x3b   :  { %1775 = vmatpush.bf16.msrb.mxu3 %v2840_v57  ;;  %v468_v57 = vunpack.c.h.b16 %v50_v49  ;;  %v2921_v49 = vld [vmem:[#allocation5 + $0x468] sm:$0xff] }
  0x3c   :  { %1737 = vmatpush.bf16.msrb.mxu0 %v2815_v58  ;;  %v2883_v58 = vld [vmem:[#allocation5 + $0x338] sm:$0xff] }
  0x3d   :  { %1750 = vmatpush.bf16.msrb.mxu1 %v2823_v59  ;;  %v2891_v59 = vld [vmem:[#allocation5 + $0x378] sm:$0xff] }
  0x3e   :  { %1763 = vmatpush.bf16.msrb.mxu2 %v2831_v60  ;;  %v2899_v60 = vld [vmem:[#allocation5 + $0x3b8] sm:$0xff] }
  0x3f   :  { %1776 = vmatpush.bf16.msrb.mxu3 %v2839_v61  ;;  %v2907_v61 = vld [vmem:[#allocation5 + $0x3f8] sm:$0xff] }
  0x40   :  { %1738 = vmatpush.bf16.msrb.mxu0 %v2814_v62  ;;  %v489_v62 = vpack.c.b16 %v465_v52, %v465_v52  ;;  %v2912_v52 = vld [vmem:[#allocation5 + $0x420] sm:$0xff] }
  0x41   :  { %1751 = vmatpush.bf16.msrb.mxu1 %v2822_v63  ;;  %v491_v63 = vpack.c.b16 %v467_v53, %v467_v53  ;;  %v2920_v53 = vld [vmem:[#allocation5 + $0x460] sm:$0xff] }
  0x42   :  { %1764 = vmatpush.bf16.msrb.mxu2 %v2830_v0  ;;  %v490_v0 = vpack.c.b16 %v466_v56, %v466_v56  ;;  %v2911_v56 = vld [vmem:[#allocation5 + $0x418] sm:$0xff] }
  0x43   :  { %1777 = vmatpush.bf16.msrb.mxu3 %v2838_v1  ;;  %v492_v1 = vpack.c.b16 %v468_v57, %v468_v57  ;;  %v2919_v57 = vld [vmem:[#allocation5 + $0x458] sm:$0xff] }
  0x44   :  { %1739 = vmatpush.bf16.msrb.mxu0 %v2813_v2  ;;  %v2882_v2 = vld [vmem:[#allocation5 + $0x330] sm:$0xff] }
  0x45   :  { %1752 = vmatpush.bf16.msrb.mxu1 %v2821_v3  ;;  %v2890_v3 = vld [vmem:[#allocation5 + $0x370] sm:$0xff] }
  0x46   :  { %1765 = vmatpush.bf16.msrb.mxu2 %v2829_v4  ;;  %v2898_v4 = vld [vmem:[#allocation5 + $0x3b0] sm:$0xff] }
  0x47   :  { %1778 = vmatpush.bf16.msrb.mxu3 %v2837_v5  ;;  %v2906_v5 = vld [vmem:[#allocation5 + $0x3f0] sm:$0xff] }
  0x48   :  { %1740 = vmatpush.bf16.msrb.mxu0 %v2812_v8  ;;  %v2897_v8 = vld [vmem:[#allocation5 + $0x3a8] sm:$0xff] }
  0x49   :  { %1753 = vmatpush.bf16.msrb.mxu1 %v2820_v9  ;;  %v2905_v9 = vld [vmem:[#allocation5 + $0x3e8] sm:$0xff] }
  0x4a   :  { %1766 = vmatpush.bf16.msrb.mxu2 %v2828_v12  ;;  %v2896_v12 = vld [vmem:[#allocation5 + $0x3a0] sm:$0xff] }
  0x4b   :  { %1779 = vmatpush.bf16.msrb.mxu3 %v2836_v13  ;;  %1741 = vmatmul.bf16.vlgmr.msrb.gmra.mxu0 %v485_v21  ;;  %v2904_v13 = vld [vmem:[#allocation5 + $0x3e0] sm:$0xff]  ;;  %v2902_v21 = vld [vmem:[#allocation5 + $0x3d0] sm:$0xff] }
  0x4c   :  { %1785 = vmatpush.bf16.msra.mxu0 %v2851_v16  ;;  %1754 = vmatmul.bf16.vlgmr.msrb.gmra.mxu1 %v486_v23  ;;  %v2895_v16 = vld [vmem:[#allocation5 + $0x398] sm:$0xff]  ;;  %v2885_v23 = vld [vmem:[#allocation5 + $0x348] sm:$0xff] }
  0x4d   :  { %1798 = vmatpush.bf16.msra.mxu1 %v2859_v17  ;;  %1767 = vmatmul.bf16.vlgmr.msrb.gmra.mxu2 %v487_v20  ;;  %v2903_v17 = vld [vmem:[#allocation5 + $0x3d8] sm:$0xff]  ;;  %v2894_v20 = vld [vmem:[#allocation5 + $0x390] sm:$0xff] }
  0x4e   :  { %1811 = vmatpush.bf16.msra.mxu2 %v2867_v18  ;;  %1780 = vmatmul.bf16.vlgmr.msrb.gmra.mxu3 %v488_v22  ;;  %v2878_v18 = vld [vmem:[#allocation5 + $0x310] sm:$0xff]  ;;  %v2877_v22 = vld [vmem:[#allocation5 + $0x308] sm:$0xff] }
  0x4f   :  { %1824 = vmatpush.bf16.msra.mxu3 %v2875_v19  ;;  %v2886_v19 = vld [vmem:[#allocation5 + $0x350] sm:$0xff] }
  0x50   :  { %1786 = vmatpush.bf16.msra.mxu0 %v2850_v24  ;;  %v2893_v24 = vld [vmem:[#allocation5 + $0x388] sm:$0xff] }
  0x51   :  { %1799 = vmatpush.bf16.msra.mxu1 %v2858_v25  ;;  %v2901_v25 = vld [vmem:[#allocation5 + $0x3c8] sm:$0xff] }
  0x52   :  { %1812 = vmatpush.bf16.msra.mxu2 %v2866_v26  ;;  %v51_v26 = vld [vmem:[#allocation2 + $0x30] sm:$0xff] }
  0x53   :  { %1825 = vmatpush.bf16.msra.mxu3 %v2874_v27  ;;  %v52_v27 = vld [vmem:[#allocation2 + $0x38] sm:$0xff] }
  0x54   :  { %1787 = vmatpush.bf16.msra.mxu0 %v2849_v28  ;;  %v2876_v28 = vld [vmem:[#allocation5 + $0x300] sm:$0xff] }
  0x55   :  { %1800 = vmatpush.bf16.msra.mxu1 %v2857_v29  ;;  %v2884_v29 = vld [vmem:[#allocation5 + $0x340] sm:$0xff] }
  0x56   :  { %1813 = vmatpush.bf16.msra.mxu2 %v2865_v30  ;;  %v469_v30 = vunpack.c.l.b16 %v51_v26 }
  0x57   :  { %1826 = vmatpush.bf16.msra.mxu3 %v2873_v31  ;;  %v471_v31 = vunpack.c.l.b16 %v52_v27 }
  0x58   :  { %1788 = vmatpush.bf16.msra.mxu0 %v2848_v32  ;;  %v2892_v32 = vld [vmem:[#allocation5 + $0x380] sm:$0xff] }
  0x59   :  { %1801 = vmatpush.bf16.msra.mxu1 %v2856_v33  ;;  %v2900_v33 = vld [vmem:[#allocation5 + $0x3c0] sm:$0xff] }
  0x5a   :  { %1814 = vmatpush.bf16.msra.mxu2 %v2864_v34  ;;  %v470_v34 = vunpack.c.h.b16 %v51_v26  ;;  %v2945_v26 = vld [vmem:[#allocation5 + $0x528] sm:$0xff] }
  0x5b   :  { %1827 = vmatpush.bf16.msra.mxu3 %v2872_v35  ;;  %v472_v35 = vunpack.c.h.b16 %v52_v27  ;;  %v2953_v27 = vld [vmem:[#allocation5 + $0x568] sm:$0xff] }
  0x5c   :  { %1789 = vmatpush.bf16.msra.mxu0 %v2847_v36  ;;  %v2915_v36 = vld [vmem:[#allocation5 + $0x438] sm:$0xff] }
  0x5d   :  { %1802 = vmatpush.bf16.msra.mxu1 %v2855_v37  ;;  %v2923_v37 = vld [vmem:[#allocation5 + $0x478] sm:$0xff] }
  0x5e   :  { %1815 = vmatpush.bf16.msra.mxu2 %v2863_v38  ;;  %v2931_v38 = vld [vmem:[#allocation5 + $0x4b8] sm:$0xff] }
  0x5f   :  { %1828 = vmatpush.bf16.msra.mxu3 %v2871_v39  ;;  %v2939_v39 = vld [vmem:[#allocation5 + $0x4f8] sm:$0xff] }
  0x60   :  { %1790 = vmatpush.bf16.msra.mxu0 %v2846_v40  ;;  %v493_v40 = vpack.c.b16 %v469_v30, %v469_v30  ;;  %v2969_v30 = vld [vmem:[#allocation5 + $0x5e8] sm:$0xff] }
  0x61   :  { %1803 = vmatpush.bf16.msra.mxu1 %v2854_v41  ;;  %v495_v41 = vpack.c.b16 %v471_v31, %v471_v31 }
  0x62   :  { %1816 = vmatpush.bf16.msra.mxu2 %v2862_v42  ;;  %v494_v42 = vpack.c.b16 %v470_v34, %v470_v34 }
  0x63   :  { %1829 = vmatpush.bf16.msra.mxu3 %v2870_v43  ;;  %v496_v43 = vpack.c.b16 %v472_v35, %v472_v35 }
  0x64   :  { %1791 = vmatpush.bf16.msra.mxu0 %v2845_v44  ;;  %v2914_v44 = vld [vmem:[#allocation5 + $0x430] sm:$0xff] }
  0x65   :  { %1804 = vmatpush.bf16.msra.mxu1 %v2853_v45  ;;  %v2922_v45 = vld [vmem:[#allocation5 + $0x470] sm:$0xff] }
  0x66   :  { %1817 = vmatpush.bf16.msra.mxu2 %v2861_v46  ;;  %v2930_v46 = vld [vmem:[#allocation5 + $0x4b0] sm:$0xff] }
  0x67   :  { %1830 = vmatpush.bf16.msra.mxu3 %v2869_v47  ;;  %v2938_v47 = vld [vmem:[#allocation5 + $0x4f0] sm:$0xff] }
  0x68   :  { %1792 = vmatpush.bf16.msra.mxu0 %v2844_v50  ;;  %v2929_v50 = vld [vmem:[#allocation5 + $0x4a8] sm:$0xff] }
  0x69   :  { %1805 = vmatpush.bf16.msra.mxu1 %v2852_v51  ;;  %v2937_v51 = vld [vmem:[#allocation5 + $0x4e8] sm:$0xff] }
  0x6a   :  { %1818 = vmatpush.bf16.msra.mxu2 %v2860_v54  ;;  %v2928_v54 = vld [vmem:[#allocation5 + $0x4a0] sm:$0xff] }
  0x6b   :  { %1831 = vmatpush.bf16.msra.mxu3 %v2868_v55  ;;  %1793 = vmatmul.bf16.vlgmr.msra.gmra.mxu0 %v489_v62  ;;  %v2936_v55 = vld [vmem:[#allocation5 + $0x4e0] sm:$0xff]  ;;  %v2926_v62 = vld [vmem:[#allocation5 + $0x490] sm:$0xff] }
  0x6c   :  { %1837 = vmatpush.bf16.msrb.mxu0 %v2883_v58  ;;  %1806 = vmatmul.bf16.vlgmr.msra.gmra.mxu1 %v490_v0  ;;  %v2927_v58 = vld [vmem:[#allocation5 + $0x498] sm:$0xff]  ;;  %v2909_v0 = vld [vmem:[#allocation5 + $0x408] sm:$0xff] }
  0x6d   :  { %1850 = vmatpush.bf16.msrb.mxu1 %v2891_v59  ;;  %1819 = vmatmul.bf16.vlgmr.msra.gmra.mxu2 %v491_v63  ;;  %v2935_v59 = vld [vmem:[#allocation5 + $0x4d8] sm:$0xff]  ;;  %v2934_v63 = vld [vmem:[#allocation5 + $0x4d0] sm:$0xff] }
  0x6e   :  { %1863 = vmatpush.bf16.msrb.mxu2 %v2899_v60  ;;  %1832 = vmatmul.bf16.vlgmr.msra.gmra.mxu3 %v492_v1  ;;  %v2910_v60 = vld [vmem:[#allocation5 + $0x410] sm:$0xff]  ;;  %v2917_v1 = vld [vmem:[#allocation5 + $0x448] sm:$0xff] }
  0x6f   :  { %1876 = vmatpush.bf16.msrb.mxu3 %v2907_v61  ;;  %v2918_v61 = vld [vmem:[#allocation5 + $0x450] sm:$0xff] }
  0x70   :  { %1838 = vmatpush.bf16.msrb.mxu0 %v2882_v2  ;;  %v2925_v2 = vld [vmem:[#allocation5 + $0x488] sm:$0xff] }
  0x71   :  { %1851 = vmatpush.bf16.msrb.mxu1 %v2890_v3  ;;  %v2933_v3 = vld [vmem:[#allocation5 + $0x4c8] sm:$0xff] }
  0x72   :  { %1864 = vmatpush.bf16.msrb.mxu2 %v2898_v4  ;;  %v53_v4 = vld [vmem:[#allocation2 + $0x40] sm:$0xff] }
  0x73   :  { %1877 = vmatpush.bf16.msrb.mxu3 %v2906_v5  ;;  %v54_v5 = vld [vmem:[#allocation2 + $0x48] sm:$0xff] }
  0x74   :  { %1839 = vmatpush.bf16.msrb.mxu0 %v2881_v6  ;;  %v2908_v6 = vld [vmem:[#allocation5 + $0x400] sm:$0xff] }
  0x75   :  { %1852 = vmatpush.bf16.msrb.mxu1 %v2889_v7  ;;  %v2916_v7 = vld [vmem:[#allocation5 + $0x440] sm:$0xff] }
  0x76   :  { %1865 = vmatpush.bf16.msrb.mxu2 %v2897_v8  ;;  %v473_v8 = vunpack.c.l.b16 %v53_v4 }
  0x77   :  { %1878 = vmatpush.bf16.msrb.mxu3 %v2905_v9  ;;  %v475_v9 = vunpack.c.l.b16 %v54_v5 }
  0x78   :  { %1840 = vmatpush.bf16.msrb.mxu0 %v2880_v10  ;;  %v2924_v10 = vld [vmem:[#allocation5 + $0x480] sm:$0xff] }
  0x79   :  { %1853 = vmatpush.bf16.msrb.mxu1 %v2888_v11  ;;  %v2932_v11 = vld [vmem:[#allocation5 + $0x4c0] sm:$0xff] }
  0x7a   :  { %1866 = vmatpush.bf16.msrb.mxu2 %v2896_v12  ;;  %v474_v12 = vunpack.c.h.b16 %v53_v4  ;;  %v2964_v4 = vld [vmem:[#allocation5 + $0x5c0] sm:$0xff] }
  0x7b   :  { %1879 = vmatpush.bf16.msrb.mxu3 %v2904_v13  ;;  %v476_v13 = vunpack.c.h.b16 %v54_v5 }
  0x7c   :  { %1841 = vmatpush.bf16.msrb.mxu0 %v2879_v14  ;;  %v2947_v14 = vld [vmem:[#allocation5 + $0x538] sm:$0xff] }
  0x7d   :  { %1854 = vmatpush.bf16.msrb.mxu1 %v2887_v15  ;;  %v2955_v15 = vld [vmem:[#allocation5 + $0x578] sm:$0xff] }
  0x7e   :  { %1867 = vmatpush.bf16.msrb.mxu2 %v2895_v16  ;;  %v2963_v16 = vld [vmem:[#allocation5 + $0x5b8] sm:$0xff] }
  0x7f   :  { %1880 = vmatpush.bf16.msrb.mxu3 %v2903_v17  ;;  %v2971_v17 = vld [vmem:[#allocation5 + $0x5f8] sm:$0xff] }
  0x80   :  { %1842 = vmatpush.bf16.msrb.mxu0 %v2878_v18  ;;  %v497_v18 = vpack.c.b16 %v473_v8, %v473_v8 }
  0x81   :  { %1855 = vmatpush.bf16.msrb.mxu1 %v2886_v19  ;;  %v499_v19 = vpack.c.b16 %v475_v9, %v475_v9 }
  0x82   :  { %1868 = vmatpush.bf16.msrb.mxu2 %v2894_v20  ;;  %v498_v20 = vpack.c.b16 %v474_v12, %v474_v12 }
  0x83   :  { %1881 = vmatpush.bf16.msrb.mxu3 %v2902_v21  ;;  %v500_v21 = vpack.c.b16 %v476_v13, %v476_v13 }
  0x84   :  { %1843 = vmatpush.bf16.msrb.mxu0 %v2877_v22  ;;  %v2946_v22 = vld [vmem:[#allocation5 + $0x530] sm:$0xff] }
  0x85   :  { %1856 = vmatpush.bf16.msrb.mxu1 %v2885_v23  ;;  %v2954_v23 = vld [vmem:[#allocation5 + $0x570] sm:$0xff] }
  0x86   :  { %1869 = vmatpush.bf16.msrb.mxu2 %v2893_v24  ;;  %v2962_v24 = vld [vmem:[#allocation5 + $0x5b0] sm:$0xff] }
  0x87   :  { %1882 = vmatpush.bf16.msrb.mxu3 %v2901_v25  ;;  %v2970_v25 = vld [vmem:[#allocation5 + $0x5f0] sm:$0xff] }
  0x88   :  { %1844 = vmatpush.bf16.msrb.mxu0 %v2876_v28  ;;  %v2977_v28 = vld [vmem:[%s3095_s2] ss:$0 sm:$0xff]  ;;  %s3060_s2 = smov [#allocation7]  }
  0x89   :  { %1857 = vmatpush.bf16.msrb.mxu1 %v2884_v29  ;;  %v2961_v29 = vld [vmem:[#allocation5 + $0x5a8] sm:$0xff]  ;;  %s1999_s24 = sshll.u32 %s3060_s2, 4  ;;  %s2000_s24 = int_to_ptr.vmem [resolvable:$true] %s1999_s24 }
  0x8a   :  { %1870 = vmatpush.bf16.msrb.mxu2 %v2892_v32  ;;  %v2944_v32 = vld [vmem:[#allocation5 + $0x520] sm:$0xff] }
  0x8b   :  { %1883 = vmatpush.bf16.msrb.mxu3 %v2900_v33  ;;  %1845 = vmatmul.bf16.vlgmr.msrb.gmra.mxu0 %v493_v40  ;;  %v2952_v33 = vld [vmem:[#allocation5 + $0x560] sm:$0xff]  ;;  %v2951_v40 = vld [vmem:[#allocation5 + $0x558] sm:$0xff] }
  0x8c   :  { %1889 = vmatpush.bf16.msra.mxu0 %v2915_v36  ;;  %1858 = vmatmul.bf16.vlgmr.msrb.gmra.mxu1 %v494_v42  ;;  %v2960_v36 = vld [vmem:[#allocation5 + $0x5a0] sm:$0xff]  ;;  %v2967_v42 = vld [vmem:[#allocation5 + $0x5d8] sm:$0xff] }
  0x8d   :  { %1902 = vmatpush.bf16.msra.mxu1 %v2923_v37  ;;  %1871 = vmatmul.bf16.vlgmr.msrb.gmra.mxu2 %v495_v41  ;;  %v2968_v37 = vld [vmem:[#allocation5 + $0x5e0] sm:$0xff]  ;;  %v2959_v41 = vld [vmem:[#allocation5 + $0x598] sm:$0xff] }
  0x8e   :  { %1915 = vmatpush.bf16.msra.mxu2 %v2931_v38  ;;  %1884 = vmatmul.bf16.vlgmr.msrb.gmra.mxu3 %v496_v43 }
  0x8f   :  { %1928 = vmatpush.bf16.msra.mxu3 %v2939_v39  ;;  %v2943_v39 = vld [vmem:[#allocation5 + $0x518] sm:$0xff] }
  0x90   :  { %1890 = vmatpush.bf16.msra.mxu0 %v2914_v44 }
  0x91   :  { %1903 = vmatpush.bf16.msra.mxu1 %v2922_v45 }
  0x92   :  { %1916 = vmatpush.bf16.msra.mxu2 %v2930_v46 }
  0x93   :  { %1929 = vmatpush.bf16.msra.mxu3 %v2938_v47  ;;  %v2942_v47 = vld [vmem:[#allocation5 + $0x510] sm:$0xff] }
  0x94   :  { %1891 = vmatpush.bf16.msra.mxu0 %v2913_v48  ;;  %v2950_v48 = vld [vmem:[#allocation5 + $0x550] sm:$0xff] }
  0x95   :  { %1904 = vmatpush.bf16.msra.mxu1 %v2921_v49 }
  0x96   :  { %1917 = vmatpush.bf16.msra.mxu2 %v2929_v50 }
  0x97   :  { %1930 = vmatpush.bf16.msra.mxu3 %v2937_v51  ;;  %v2958_v51 = vld [vmem:[#allocation5 + $0x590] sm:$0xff] }
  0x98   :  { %1892 = vmatpush.bf16.msra.mxu0 %v2912_v52  ;;  %v2966_v52 = vld [vmem:[#allocation5 + $0x5d0] sm:$0xff] }
  0x99   :  { %1905 = vmatpush.bf16.msra.mxu1 %v2920_v53  ;;  %v2941_v53 = vld [vmem:[#allocation5 + $0x508] sm:$0xff] }
  0x9a   :  { %1918 = vmatpush.bf16.msra.mxu2 %v2928_v54  ;;  %v2949_v54 = vld [vmem:[#allocation5 + $0x548] sm:$0xff] }
  0x9b   :  { %1931 = vmatpush.bf16.msra.mxu3 %v2936_v55  ;;  %v55_v55 = vld [vmem:[#allocation2 + $0x50] sm:$0xff] }
  0x9c   :  { %1893 = vmatpush.bf16.msra.mxu0 %v2911_v56  ;;  %v2957_v56 = vld [vmem:[#allocation5 + $0x588] sm:$0xff] }
  0x9d   :  { %1906 = vmatpush.bf16.msra.mxu1 %v2919_v57  ;;  %v2965_v57 = vld [vmem:[#allocation5 + $0x5c8] sm:$0xff] }
  0x9e   :  { %1919 = vmatpush.bf16.msra.mxu2 %v2927_v58  ;;  %v56_v58 = vld [vmem:[#allocation2 + $0x58] sm:$0xff] }
  0x9f   :  { %1932 = vmatpush.bf16.msra.mxu3 %v2935_v59 }
  0xa0   :  { %1894 = vmatpush.bf16.msra.mxu0 %v2910_v60 }
  0xa1   :  { %1907 = vmatpush.bf16.msra.mxu1 %v2918_v61  ;;  %v477_v61 = vunpack.c.l.b16 %v55_v55 }
  0xa2   :  { %1920 = vmatpush.bf16.msra.mxu2 %v2926_v62  ;;  %v478_v62 = vunpack.c.h.b16 %v55_v55 }
  0xa3   :  { %1933 = vmatpush.bf16.msra.mxu3 %v2934_v63  ;;  %v2940_v63 = vld [vmem:[#allocation5 + $0x500] sm:$0xff]  ;;  %v501_v5 = vpack.c.b16 %v477_v61, %v477_v61 }
  0xa4   :  { %1895 = vmatpush.bf16.msra.mxu0 %v2909_v0  ;;  %v2948_v0 = vld [vmem:[#allocation5 + $0x540] sm:$0xff] }
  0xa5   :  { %1908 = vmatpush.bf16.msra.mxu1 %v2917_v1  ;;  %v479_v1 = vunpack.c.l.b16 %v56_v58 }
  0xa6   :  { %1921 = vmatpush.bf16.msra.mxu2 %v2925_v2  ;;  %v480_v2 = vunpack.c.h.b16 %v56_v58 }
  0xa7   :  { %1934 = vmatpush.bf16.msra.mxu3 %v2933_v3  ;;  %v2956_v3 = vld [vmem:[#allocation5 + $0x580] sm:$0xff] }
  0xa8   :  { %1896 = vmatpush.bf16.msra.mxu0 %v2908_v6  ;;  %v1690_v31 = vpop.f32.mrf.mxu0  ;;  %v502_v6 = vpack.c.b16 %v478_v62, %v478_v62  ;;  %v504_v8 = vpack.c.b16 %v480_v2, %v480_v2 }
  0xa9   :  { %1909 = vmatpush.bf16.msra.mxu1 %v2916_v7  ;;  %v1691_v34 = vadd.f32 %v2977_v28, %v1690_v31  ;;  %v1703_v35 = vpop.f32.mrf.mxu1  ;;  %v503_v7 = vpack.c.b16 %v479_v1, %v479_v1 }
  0xaa   :  { %1922 = vmatpush.bf16.msra.mxu2 %v2924_v10 }
  0xab   :  { %1935 = vmatpush.bf16.msra.mxu3 %v2932_v11  ;;  %1897 = vmatmul.bf16.vlgmr.msra.gmra.mxu0 %v497_v18  ;;  %v1704_v38 = vadd.f32 %v1703_v35, %v1691_v34 }
  0xac   :  { %1941 = vmatpush.bf16.msrb.mxu0 %v2947_v14  ;;  %1910 = vmatmul.bf16.vlgmr.msra.gmra.mxu1 %v498_v20 }
  0xad   :  { %1954 = vmatpush.bf16.msrb.mxu1 %v2955_v15  ;;  %1923 = vmatmul.bf16.vlgmr.msra.gmra.mxu2 %v499_v19 }
  0xae   :  { %1967 = vmatpush.bf16.msrb.mxu2 %v2963_v16  ;;  %1936 = vmatmul.bf16.vlgmr.msra.gmra.mxu3 %v500_v21 }
  0xaf   :  { %1980 = vmatpush.bf16.msrb.mxu3 %v2971_v17 }
  0xb0   :  { %1942 = vmatpush.bf16.msrb.mxu0 %v2946_v22  ;;  %v1716_v43 = vpop.f32.mrf.mxu2  ;;  %v1692_v46 = vpop.f32.mrf.mxu0 }
  0xb1   :  { %1955 = vmatpush.bf16.msrb.mxu1 %v2954_v23  ;;  %v1717_v44 = vadd.f32 %v1716_v43, %v1704_v38  ;;  %v1729_v45 = vpop.f32.mrf.mxu3  ;;  %v1705_v50 = vpop.f32.mrf.mxu1 }
  0xb2   :  { %1968 = vmatpush.bf16.msrb.mxu2 %v2962_v24 }
  0xb3   :  { %1981 = vmatpush.bf16.msrb.mxu3 %v2970_v25  ;;  %v1730_v49 = vadd.f32 %v1729_v45, %v1717_v44 }
  0xb4   :  { %1943 = vmatpush.bf16.msrb.mxu0 %v2945_v26 }
  0xb5   :  { %1956 = vmatpush.bf16.msrb.mxu1 %v2953_v27 }
  0xb6   :  { %1969 = vmatpush.bf16.msrb.mxu2 %v2961_v29 }
  0xb7   :  { %1982 = vmatpush.bf16.msrb.mxu3 %v2969_v30 }
  0xb8   :  { %1944 = vmatpush.bf16.msrb.mxu0 %v2944_v32  ;;  %v1718_v59 = vpop.f32.mrf.mxu2 }
  0xb9   :  { %1957 = vmatpush.bf16.msrb.mxu1 %v2952_v33  ;;  %v1731_v60 = vpop.f32.mrf.mxu3 }
  0xba   :  { %1970 = vmatpush.bf16.msrb.mxu2 %v2960_v36 }
  0xbb   :  { %1983 = vmatpush.bf16.msrb.mxu3 %v2968_v37 }
  0xbc   :  { %1945 = vmatpush.bf16.msrb.mxu0 %v2943_v39 }
  0xbd   :  { %1958 = vmatpush.bf16.msrb.mxu1 %v2951_v40 }
  0xbe   :  { %1971 = vmatpush.bf16.msrb.mxu2 %v2959_v41 }
  0xbf   :  { %1984 = vmatpush.bf16.msrb.mxu3 %v2967_v42 }
  0xc0   :  { %1946 = vmatpush.bf16.msrb.mxu0 %v2942_v47 }
  0xc1   :  { %1959 = vmatpush.bf16.msrb.mxu1 %v2950_v48 }
  0xc2   :  { %1972 = vmatpush.bf16.msrb.mxu2 %v2958_v51 }
  0xc3   :  { %1985 = vmatpush.bf16.msrb.mxu3 %v2966_v52 }
  0xc4   :  { %1947 = vmatpush.bf16.msrb.mxu0 %v2941_v53 }
  0xc5   :  { %1960 = vmatpush.bf16.msrb.mxu1 %v2949_v54 }
  0xc6   :  { %1973 = vmatpush.bf16.msrb.mxu2 %v2957_v56 }
  0xc7   :  { %1986 = vmatpush.bf16.msrb.mxu3 %v2965_v57 }
  0xc8   :  { %1948 = vmatpush.bf16.msrb.mxu0 %v2940_v63  ;;  %v1742_v9 = vpop.f32.mrf.mxu0 }
  0xc9   :  { %1961 = vmatpush.bf16.msrb.mxu1 %v2948_v0  ;;  %v1743_v10 = vadd.f32 %v1742_v9, %v1730_v49  ;;  %v1755_v11 = vpop.f32.mrf.mxu1 }
  0xca   :  { %1974 = vmatpush.bf16.msrb.mxu2 %v2956_v3 }
  0xcb   :  { %1987 = vmatpush.bf16.msrb.mxu3 %v2964_v4  ;;  %1949 = vmatmul.bf16.vlgmr.msrb.gmra.mxu0 %v501_v5  ;;  %v1756_v12 = vadd.f32 %v1755_v11, %v1743_v10 }
  0xcc   :  { %1962 = vmatmul.bf16.vlgmr.msrb.gmra.mxu1 %v502_v6 }
  0xcd   :  { %1975 = vmatmul.bf16.vlgmr.msrb.gmra.mxu2 %v503_v7 }
  0xce   :  { %1988 = vmatmul.bf16.vlgmr.msrb.gmra.mxu3 %v504_v8 }
  0xd0   :  { %v1768_v13 = vpop.f32.mrf.mxu2  ;;  %v1744_v16 = vpop.f32.mrf.mxu0 }
  0xd1   :  { %v1769_v14 = vadd.f32 %v1768_v13, %v1756_v12  ;;  %v1781_v15 = vpop.f32.mrf.mxu3  ;;  %v1757_v18 = vpop.f32.mrf.mxu1 }
  0xd3   :  { %v1782_v17 = vadd.f32 %v1781_v15, %v1769_v14 }
  0xd8   :  { %v1770_v19 = vpop.f32.mrf.mxu2 }
  0xd9   :  { %v1783_v20 = vpop.f32.mrf.mxu3 }
  0xe8   :  { %v1794_v21 = vpop.f32.mrf.mxu0 }
  0xe9   :  { %v1795_v22 = vadd.f32 %v1794_v21, %v1782_v17  ;;  %v1807_v23 = vpop.f32.mrf.mxu1 }
  0xeb   :  { %v1808_v24 = vadd.f32 %v1807_v23, %v1795_v22 }
  0xf0   :  { %v1820_v25 = vpop.f32.mrf.mxu2  ;;  %v1796_v28 = vpop.f32.mrf.mxu0 }
  0xf1   :  { %v1821_v26 = vadd.f32 %v1820_v25, %v1808_v24  ;;  %v1833_v27 = vpop.f32.mrf.mxu3  ;;  %v1809_v30 = vpop.f32.mrf.mxu1 }
  0xf3   :  { %v1834_v29 = vadd.f32 %v1833_v27, %v1821_v26 }
  0xf8   :  { %v1822_v31 = vpop.f32.mrf.mxu2 }
  0xf9   :  { %v1835_v32 = vpop.f32.mrf.mxu3 }
 0x108   :  { %v1846_v33 = vpop.f32.mrf.mxu0 }
 0x109   :  { %v1859_v34 = vpop.f32.mrf.mxu1  ;;  %v1847_v44 = vadd.f32 %v1846_v33, %v1834_v29 }
 0x10b   :  { %v1860_v48 = vadd.f32 %v1859_v34, %v1847_v44 }
 0x110   :  { %v1872_v35 = vpop.f32.mrf.mxu2  ;;  %v1848_v37 = vpop.f32.mrf.mxu0 }
 0x111   :  { %v1885_v36 = vpop.f32.mrf.mxu3  ;;  %v1861_v38 = vpop.f32.mrf.mxu1  ;;  %v1873_v49 = vadd.f32 %v1872_v35, %v1860_v48 }
 0x113   :  { %v1886_v52 = vadd.f32 %v1885_v36, %v1873_v49 }
 0x118   :  { %v1874_v39 = vpop.f32.mrf.mxu2 }
 0x119   :  { %v1887_v40 = vpop.f32.mrf.mxu3 }
 0x128   :  { %v1898_v41 = vpop.f32.mrf.mxu0 }
 0x129   :  { %v1911_v42 = vpop.f32.mrf.mxu1  ;;  %v1899_v53 = vadd.f32 %v1898_v41, %v1886_v52 }
 0x12b   :  { %v1912_v54 = vadd.f32 %v1911_v42, %v1899_v53 }
 0x130   :  { %v1924_v43 = vpop.f32.mrf.mxu2  ;;  %v1900_v46 = vpop.f32.mrf.mxu0 }
 0x131   :  { %v1937_v45 = vpop.f32.mrf.mxu3  ;;  %v1913_v47 = vpop.f32.mrf.mxu1  ;;  %v1925_v55 = vadd.f32 %v1924_v43, %v1912_v54 }
 0x133   :  { %v1938_v56 = vadd.f32 %v1937_v45, %v1925_v55 }
 0x138   :  { %v1926_v50 = vpop.f32.mrf.mxu2 }
 0x139   :  { %v1939_v51 = vpop.f32.mrf.mxu3 }
 0x148   :  { %v1950_v57 = vpop.f32.mrf.mxu0 }
 0x149   :  { %v1963_v58 = vpop.f32.mrf.mxu1  ;;  %v1951_v59 = vadd.f32 %v1950_v57, %v1938_v56 }
 0x14b   :  { %v1964_v60 = vadd.f32 %v1963_v58, %v1951_v59 }
 0x150   :  { %v1976_v61 = vpop.f32.mrf.mxu2  ;;  %v1952_v0 = vpop.f32.mrf.mxu0 }
 0x151   :  { %v1989_v62 = vpop.f32.mrf.mxu3  ;;  %v1977_v63 = vadd.f32 %v1976_v61, %v1964_v60  ;;  %v1965_v1 = vpop.f32.mrf.mxu1 }
 0x153   :  { %v1990_v2 = vadd.f32 %v1989_v62, %v1977_v63 }
 0x155   :  { %1993 = vst [vmem:[#allocation7] sm:$0xff] %v1990_v2 }
 0x156   :  { %2004 = dma.vmem_to_hbm [thread:$0]  %s2000_s24, 128, %s2002_s27, [#allocation4]  }
 0x158   :  { %v1978_v3 = vpop.f32.mrf.mxu2 }
 0x159   :  { %v1991_v4 = vpop.f32.mrf.mxu3 }
 0x15a   :  { %3054 = dma.done.wait [#allocation4], 128  }
 0x15b   :  { %3055 = vsyncadd [#allocation4], 4294967168 }
 0x15c   :  { %2009 = vsyncpa [#allocation3], 1 }
 0x15d   :  { %2010 = vsyncpa [#allocation6], 1 }
 0x15e   :  { %2011 = vsyncpa [#allocation4], 1 }

</bundles_post_ra>
